<compile_context>
chip_gen: v7x
topology: tpu7x:2x2x1
jax: 0.10.0
libtpu: 0.0.40
codegen_flags: <defaults>
</compile_context>

<pallas_src>
import functools

import jax
import jax.numpy as jnp
from jax.experimental import pallas as pl
from jax.experimental.pallas import tpu as pltpu

MARGIN = 1.0
EPSILON = 1e-10

_SUBLANE = 16          # multiple of f32 (8) and bf16 (16) sublane tiles
_MAX_TILE_ROWS = 8192  # upper bound on rows per grid step


def _physical_vmem_bytes():
    """Best-effort physical VMEM query; conservative (v7x-class) fallback."""
    try:
        info = pltpu.get_tpu_info()
        vmem = getattr(info, "vmem_capacity_bytes", None)
        if vmem:
            return int(vmem)
    except Exception:
        pass
    return 64 * 1024 * 1024


def _tile_rows(batch, feat, itemsize, input_budget, min_step_bytes):
    """Pick rows per grid step + the per-row VMEM cost estimate."""
    # VMEM bytes per tile row:
    #   2 inputs x 2 pipeline buffers, native dtype      -> 4 * feat * itemsize
    #   ~3 live f32 tile temporaries (casts, diff)       -> 3 * feat * 4
    #   lane-padded (tile_b, 1) columns (2 label buffers
    #   + ~4 f32 temporaries)                            -> 6 * 128 * 4
    per_row_vmem = feat * (4 * itemsize + 12) + 3072
    rows_by_vmem = max(_SUBLANE, input_budget // per_row_vmem)
    # Enough rows per step to amortize the ~0.35us pipeline overhead.
    rows_by_step = pl.cdiv(min_step_bytes, 2 * feat * itemsize)
    desired = max(512, rows_by_step)

    if batch < _SUBLANE:
        # Single block equal to the full (sub-sublane) batch dimension.
        return batch, per_row_vmem

    batch_floor = (batch // _SUBLANE) * _SUBLANE
    tile = min(desired, rows_by_vmem, _MAX_TILE_ROWS, batch_floor)
    tile = max(_SUBLANE, (tile // _SUBLANE) * _SUBLANE)
    return tile, per_row_vmem


def _contrastive_loss_kernel(z1_ref, z2_ref, label_ref, out_ref, *,
                             batch, tile_b, margin, epsilon, needs_mask):
    # Cast on the loaded tile: inputs stream HBM->VMEM in their native dtype.
    z1 = z1_ref[...].astype(jnp.float32)
    z2 = z2_ref[...].astype(jnp.float32)
    diff = z1 - z2
    sq_sum = jnp.sum(diff * diff, axis=1, keepdims=True)        # (tile_b, 1)
    dist = jnp.sqrt(sq_sum) + epsilon                           # (tile_b, 1)

    lab = label_ref[...]                                        # (tile_b, 1) f32
    hinge = jnp.maximum(margin - dist, 0.0)
    per_row = lab * dist * dist + (1.0 - lab) * hinge * hinge   # (tile_b, 1)

    def _store_partial(rows):
        # Every lane of the (1, 8, 128) output block carries the same partial
        # sum (wrapper reads [:, 0, 0]); keeps the output block (8,128)-aligned.
        out_ref[...] = jnp.broadcast_to(jnp.sum(rows), out_ref.shape)

    if needs_mask:
        i = pl.program_id(0)
        last = pl.num_programs(0) - 1

        @pl.when(i != last)
        def _():
            _store_partial(per_row)

        # Only the final tile reads past the end of the arrays; garbage rows
        # (possibly NaN/Inf) are removed with a select, which is NaN-safe.
        @pl.when(i == last)
        def _():
            row_ids = (jax.lax.broadcasted_iota(jnp.int32, per_row.shape, 0)
                       + i * tile_b)
            _store_partial(jnp.where(row_ids < batch, per_row, 0.0))
    else:
        _store_partial(per_row)


def contrastive_loss(z1, z2, label, *, margin=MARGIN, epsilon=EPSILON):
    batch, feat = z1.shape
    assert z2.shape == (batch, feat)
    itemsize = jnp.dtype(z1.dtype).itemsize

    phys_vmem = _physical_vmem_bytes()
    small_vmem = phys_vmem <= 64 * 1024 * 1024               # v7x-class part
    input_budget = (24 if small_vmem else 72) * 1024 * 1024
    limit_cap = (48 if small_vmem else 100) * 1024 * 1024
    min_step_bytes = (8 if small_vmem else 4) * 1024 * 1024  # higher BW -> bigger steps

    tile_b, per_row_vmem = _tile_rows(batch, feat, itemsize,
                                      input_budget, min_step_bytes)
    num_tiles = pl.cdiv(batch, tile_b)
    needs_mask = (batch % tile_b) != 0

    label2d = label.reshape(batch, 1).astype(jnp.float32)

    vmem_limit = int(min(limit_cap,
                         max(32 * 1024 * 1024,
                             tile_b * per_row_vmem + 8 * 1024 * 1024)))

    kernel = functools.partial(
        _contrastive_loss_kernel,
        batch=batch, tile_b=tile_b,
        margin=float(margin), epsilon=float(epsilon),
        needs_mask=needs_mask)

    partials = pl.pallas_call(
        kernel,
        out_shape=jax.ShapeDtypeStruct((num_tiles, 8, 128), jnp.float32),
        grid=(num_tiles,),
        in_specs=[
            pl.BlockSpec((tile_b, feat), lambda i: (i, 0)),
            pl.BlockSpec((tile_b, feat), lambda i: (i, 0)),
            pl.BlockSpec((tile_b, 1), lambda i: (i, 0)),
        ],
        out_specs=pl.BlockSpec((1, 8, 128), lambda i: (i, 0, 0)),
        compiler_params=pltpu.CompilerParams(
            dimension_semantics=("parallel",),
            vmem_limit_bytes=vmem_limit),
        cost_estimate=pl.CostEstimate(
            flops=4 * batch * feat,
            transcendentals=batch,
            bytes_accessed=(2 * batch * feat * itemsize + batch * 4
                            + num_tiles * 8 * 128 * 4)),
    )(z1, z2, label2d)

    # Tiny final reduction over per-tile partials (also better precision than
    # a single running f32 accumulator).
    return jnp.sum(partials[:, 0, 0]) / (2.0 * batch)


def _reference(z1, z2, label, margin=MARGIN, epsilon=EPSILON):
    z1 = z1.astype(jnp.float32)
    z2 = z2.astype(jnp.float32)
    dist = jnp.sqrt(jnp.sum((z1 - z2) ** 2, axis=1)) + epsilon
    pos = label * dist ** 2
    neg = (1.0 - label) * jnp.maximum(margin - dist, 0.0) ** 2
    return jnp.mean(pos + neg) / 2.0


if __name__ == "__main__":
    key = jax.random.PRNGKey(0)
    k1, k2, k3, k4, k5, k6 = jax.random.split(key, 6)

    # Primary check: shapes consistent with the module's forward (f32).
    B, D = 8, 32
    z1 = jax.random.normal(k1, (B, D), dtype=jnp.float32)
    z2 = jax.random.normal(k2, (B, D), dtype=jnp.float32)
    label = jax.random.bernoulli(k3, 0.5, (B,)).astype(jnp.float32)

    loss = contrastive_loss(z1, z2, label)
    jax.block_until_ready(loss)
    ref = _reference(z1, z2, label)
    assert jnp.allclose(loss, ref, atol=1e-5, rtol=1e-5), (loss, ref)

    # Secondary check: bf16 inputs + batch not a multiple of the tile rows
    # (exercises the in-kernel cast, the un-padded boundary block and the
    # pl.when-gated OOB-row mask).
    B2, D2 = 40, 160
    z1b = jax.random.normal(k4, (B2, D2), dtype=jnp.bfloat16)
    z2b = jax.random.normal(k5, (B2, D2), dtype=jnp.bfloat16)
    labelb = jax.random.bernoulli(k6, 0.5, (B2,)).astype(jnp.float32)

    loss_b = contrastive_loss(z1b, z2b, labelb)
    jax.block_until_ready(loss_b)
    ref_b = _reference(z1b, z2b, labelb)
    assert jnp.allclose(loss_b, ref_b, atol=1e-4, rtol=1e-4), (loss_b, ref_b)

    print("KERNEL_OK")
</pallas_src>

<mosaic_0001>
module attributes {stable_mosaic.version = 11 : i64} {
  func.func @_contrastive_loss_kernel(%arg0: i32, %arg1: memref<8x32xf32, #tpu.memory_space<vmem>>, %arg2: memref<8x32xf32, #tpu.memory_space<vmem>>, %arg3: memref<8x1xf32, #tpu.memory_space<vmem>>, %arg4: memref<1x8x128xf32, #tpu.memory_space<vmem>>) attributes {dimension_semantics = [#tpu.dimension_semantics<parallel>], iteration_bounds = array<i64: 1>, scalar_prefetch = 0 : i64, scratch_operands = 0 : i64, tpu.core_type = #tpu.core_type<tc>, window_params = [{transform_indices = @transform_0, window_bounds = array<i64: 8, 32>}, {transform_indices = @transform_1, window_bounds = array<i64: 8, 32>}, {transform_indices = @transform_2, window_bounds = array<i64: 8, 1>}, {transform_indices = @transform_3, window_bounds = array<i64: 1, 8, 128>}]} {
    %c0 = arith.constant 0 : index
    %c0_0 = arith.constant 0 : index
    %0 = vector.load %arg1[%c0, %c0_0] : memref<8x32xf32, #tpu.memory_space<vmem>>, vector<8x32xf32>
    %c0_1 = arith.constant 0 : index
    %c0_2 = arith.constant 0 : index
    %1 = vector.load %arg2[%c0_1, %c0_2] : memref<8x32xf32, #tpu.memory_space<vmem>>, vector<8x32xf32>
    %2 = arith.subf %0, %1 : vector<8x32xf32>
    %3 = arith.mulf %2, %2 : vector<8x32xf32>
    %cst = arith.constant dense<0.000000e+00> : vector<8xf32>
    %4 = vector.multi_reduction <add>, %3, %cst [1] : vector<8x32xf32> to vector<8xf32>
    %5 = vector.shape_cast %4 : vector<8xf32> to vector<8x1xf32>
    %6 = math.sqrt %5 : vector<8x1xf32>
    %cst_3 = arith.constant 1.000000e-10 : f32
    %7 = vector.broadcast %cst_3 : f32 to vector<8x1xf32>
    %8 = arith.addf %6, %7 : vector<8x1xf32>
    %c0_4 = arith.constant 0 : index
    %c0_5 = arith.constant 0 : index
    %9 = vector.load %arg3[%c0_4, %c0_5] : memref<8x1xf32, #tpu.memory_space<vmem>>, vector<8x1xf32>
    %cst_6 = arith.constant 1.000000e+00 : f32
    %10 = vector.broadcast %cst_6 : f32 to vector<8x1xf32>
    %11 = arith.subf %10, %8 : vector<8x1xf32>
    %cst_7 = arith.constant 0.000000e+00 : f32
    %12 = vector.broadcast %cst_7 : f32 to vector<8x1xf32>
    %13 = arith.maximumf %11, %12 : vector<8x1xf32>
    %14 = arith.mulf %9, %8 : vector<8x1xf32>
    %15 = arith.mulf %14, %8 : vector<8x1xf32>
    %cst_8 = arith.constant 1.000000e+00 : f32
    %16 = vector.broadcast %cst_8 : f32 to vector<8x1xf32>
    %17 = arith.subf %16, %9 : vector<8x1xf32>
    %18 = arith.mulf %17, %13 : vector<8x1xf32>
    %19 = arith.mulf %18, %13 : vector<8x1xf32>
    %20 = arith.addf %15, %19 : vector<8x1xf32>
    %21 = vector.shape_cast %20 : vector<8x1xf32> to vector<1x8x1xf32>
    %cst_9 = arith.constant dense<0.000000e+00> : vector<1xf32>
    %22 = vector.multi_reduction <add>, %21, %cst_9 [1, 2] : vector<1x8x1xf32> to vector<1xf32>
    %23 = vector.shape_cast %22 : vector<1xf32> to vector<1x1x1xf32>
    %24 = vector.extract %23[0, 0, 0] : f32 from vector<1x1x1xf32>
    %25 = vector.broadcast %24 : f32 to vector<1x8x128xf32>
    %c0_10 = arith.constant 0 : index
    %c0_11 = arith.constant 0 : index
    %c0_12 = arith.constant 0 : index
    %26 = vector.load %arg4[%c0_10, %c0_11, %c0_12] : memref<1x8x128xf32, #tpu.memory_space<vmem>>, vector<1x8x128xf32>
    tpu.vector_store %arg4[%c0_10, %c0_11, %c0_12], %25 {strides = array<i32>} : memref<1x8x128xf32, #tpu.memory_space<vmem>>, vector<1x8x128xf32>,
    return
  }
  func.func @transform_0(%arg0: i32) -> (i32, i32) {
    %c0_i32 = arith.constant 0 : i32
    %c0_i32_0 = arith.constant 0 : i32
    return %arg0, %c0_i32 : i32, i32
  }
  func.func @transform_1(%arg0: i32) -> (i32, i32) {
    %c0_i32 = arith.constant 0 : i32
    %c0_i32_0 = arith.constant 0 : i32
    return %arg0, %c0_i32 : i32, i32
  }
  func.func @transform_2(%arg0: i32) -> (i32, i32) {
    %c0_i32 = arith.constant 0 : i32
    %c0_i32_0 = arith.constant 0 : i32
    return %arg0, %c0_i32 : i32, i32
  }
  func.func @transform_3(%arg0: i32) -> (i32, i32, i32) {
    %c0_i32 = arith.constant 0 : i32
    %c0_i32_0 = arith.constant 0 : i32
    %c0_i32_1 = arith.constant 0 : i32
    return %arg0, %c0_i32, %c0_i32_0 : i32, i32, i32
  }
}

</mosaic_0001>

<bundles_post_ra>
// kernel: tpu_custom_call.1
= control target key start
LH: loop header
LB: loop body
LE: loop exit
PB: predicated region body
PF: predicated region fallthrough
CT: control target
= control target key end

     0   :  { %8 = vsyncpa [#allocation3], 0  ;;  %s186_s0 = inlined_call_operand.vmem [shape: f32[8,32], index: 0, kind: input, shape index: {}]   ;;  %s187_s1 = inlined_call_operand.hbm [shape: f32[8,32], index: 1, kind: input, shape index: {}]   ;;  %s188_s2 = inlined_call_operand.vmem [shape: f32[8,1], index: 2, kind: input, shape index: {}]   ;;  %s189_s3 = inlined_call_operand.hbm [shape: f32[1,8,128], index: 3, kind: output, shape index: {}]  }
   0x1   :  { %9 = vsyncpa [#allocation4], 0  ;;  %s134_s12 = smov [#allocation2]   ;;  %s86_s16 = scalar_lea.hbm %s187_s1, 128 }
   0x2   :  { %s18_s13 = sshll.u32 %s134_s12, 4  ;;  %p87_p0 = scmp.ne.s32.totalorder %s187_s1, %s86_s16  ;;  %s19_s13 = int_to_ptr.vmem [resolvable:$true] %s18_s13 }
   0x3   :  { %p90_p1 = scmp.lt.u32.totalorder %s86_s16, %s187_s1 }
   0x5   :  { %p92_p2 = pnand %p90_p1, %p87_p0 }
   0x7   :  { %95 = shalt.err (!%p92_p2)
}
   0x8   :  { %s96_s21 = scalar_lea.vmem %s19_s13, 128  ;;  %p101_p4 = scmp.lt.s32.totalorder %s19_s13, %s19_s13 }
   0x9   :  { %p97_p3 = scmp.ne.s32.totalorder %s19_s13, %s96_s21  ;;  %p102_p5 = scmp.lt.s32.totalorder %s96_s21, %s96_s21 }
   0xb   :  { %p103_p6 = por %p102_p5, %p101_p4 }
   0xd   :  { %p104_p7 = pnand %p103_p6, %p97_p3 }
   0xf   :  { %107 = shalt.err (!%p104_p7)
}
  0x10   :  { %21 = dma.hbm_to_vmem [thread:$0]  %s187_s1, 128, %s19_s13, [#allocation3]  }
  0x11   :  { %130 = dma.done.wait [#allocation3], 128  }
  0x12   :  { %131 = vsyncadd [#allocation3], 4294967168  ;;  %v27_v0 = vld [vmem:[%s186_s0] sm:$0xff]  ;;  %vm31_vm0 = vcmask 261120   ;;  %vm52_vm3 = vcmask 7168   ;;  %s135_s0 = smov [#allocation5]  }
  0x13   :  { %v28_v1 = vld [vmem:[#allocation2] sm:$0xff] }
  0x14   :  { %v29_v2 = vsub.f32 %v27_v0, %v28_v1  ;;  %v43_v12 = vld [vmem:[%s188_s2] sm:$0xff]  ;;  %s71_s2 = sshll.u32 %s135_s0, 4  ;;  %s72_s2 = int_to_ptr.vmem [resolvable:$true] %s71_s2 }
  0x15   :  { %v48_v14 = vsub.f32 1.0, %v43_v12  ;;  %s108_s28 = scalar_lea.vmem %s72_s2, 128  ;;  %p113_p9 = scmp.lt.s32.totalorder %s72_s2, %s72_s2 }
  0x16   :  { %v30_v3 = vmul.f32 %v29_v2, %v29_v2  ;;  %p109_p8 = scmp.ne.s32.totalorder %s72_s2, %s108_s28  ;;  %p114_p10 = scmp.lt.s32.totalorder %s108_s28, %s108_s28 }
  0x18   :  { %v32_v4 = vsel %vm31_vm0, %v30_v3, 0.0  ;;  %p115_p11 = por %p114_p10, %p113_p9 }
  0x19   :  { %33 = vadd.xlane.f32.xlu0 %v32_v4 }
  0x1a   :  { %p116_p12 = pnand %p115_p11, %p109_p8 }
  0xa6   :  { %v34_v5 = vpop.xlane.xlu0 %33 }
  0xa7   :  { %84 = vrsqrt.f32 %v34_v5  ;;  %vm37_vm1 = vcmp.eq.f32.partialorder %v34_v5, inf  ;;  %v40_v8 = vand.u32 2147483648, %v34_v5  ;;  %vm39_vm2 = vcmp.eq.f32.partialorder %v34_v5, 0.0 }
  0xb1   :  { %v85_v6 = vpop.eup %84 }
  0xb2   :  { %v36_v7 = vmul.f32 %v85_v6, %v34_v5 }
  0xb4   :  { %v38_v9 = vsel %vm37_vm1, %v34_v5, %v36_v7 }
  0xb5   :  { %v41_v10 = vsel %vm39_vm2, %v40_v8, %v38_v9 }
  0xb6   :  { %v42_v11 = vadd.f32 1e-10, %v41_v10 }
  0xb8   :  { %v44_v13 = vsub.f32 1.0, %v42_v11  ;;  %v46_v16 = vmul.f32 %v43_v12, %v42_v11 }
  0xba   :  { %v45_v15 = vmax.f32 %v44_v13, 0.0  ;;  %v47_v18 = vmul.f32 %v46_v16, %v42_v11 }
  0xbc   :  { %v49_v17 = vmul.f32 %v48_v14, %v45_v15 }
  0xbe   :  { %v50_v19 = vmul.f32 %v49_v17, %v45_v15 }
  0xc0   :  { %v51_v20 = vadd.f32 %v50_v19, %v47_v18 }
  0xc2   :  { %v53_v21 = vsel %vm52_vm3, %v51_v20, 0.0 }
  0xc3   :  { %54 = vadd.xlane.f32.xlu0 %v53_v21 }
 0x150   :  { %v55_v22 = vpop.xlane.xlu0 %54 }
 0x151   :  { %v56_v23 = vrot.slane %v55_v22, 4 }
 0x153   :  { %v57_v24 = vadd.f32 %v56_v23, %v55_v22 }
 0x155   :  { %v58_v25 = vrot.slane %v57_v24, 2 }
 0x157   :  { %v59_v26 = vadd.f32 %v58_v25, %v57_v24 }
 0x159   :  { %v60_v27 = vrot.slane %v59_v26, 1 }
 0x15b   :  { %v61_v28 = vadd.f32 %v60_v27, %v59_v26 }
 0x15d   :  { %80 = vpush %v61_v28 }
 0x18e   :  { %s81_s27 = spop %80 }
 0x18f   :  { %v63_v29 = vstv %s81_s27 }
 0x190   :  { %64 = vst [vmem:[#allocation5] sm:$0xff] %v63_v29 }
 0x191   :  { %119 = shalt.err (!%p116_p12)
}
 0x192   :  { %s120_s4 = scalar_lea.hbm %s189_s3, 128 }
 0x193   :  { %p121_p13 = scmp.ne.s32.totalorder %s189_s3, %s120_s4  ;;  %p124_p0 = scmp.lt.u32.totalorder %s120_s4, %s189_s3 }
 0x195   :  { %p126_p1 = pnand %p124_p0, %p121_p13 }
 0x197   :  { %129 = shalt.err (!%p126_p1)
}
 0x198   :  { %74 = dma.vmem_to_hbm [thread:$0]  %s72_s2, 128, %s189_s3, [#allocation4]  }
 0x199   :  { %132 = dma.done.wait [#allocation4], 128  }
 0x19a   :  { %133 = vsyncadd [#allocation4], 4294967168 }
 0x19b   :  { %78 = vsyncpa [#allocation3], 1 }
 0x19c   :  { %79 = vsyncpa [#allocation4], 1 }

</bundles_post_ra>
